<compile_context>
chip_gen: v6e
topology: v6e:2x2x1
jax: 0.10.0
libtpu: 0.0.40
codegen_flags: <defaults>
</compile_context>

<pallas_src>
import jax
import jax.numpy as jnp
from jax.experimental import pallas as pl
from jax.experimental.pallas import tpu as pltpu

LANE = 128          # vreg lane width
SUBLANE = 8         # f32 sublane count
MAX_TILE_B = 2048   # batch rows per grid step
MIN_SPLIT_B = 256   # once B >= 2*this, force >=2 grid steps (v7x: 2 TCs)
OUT_W = 8           # final output lanes (2 real logits, padded to 8)


def _round_up(v, m):
    return ((v + m - 1) // m) * m


def _cdiv(a, b):
    return (a + b - 1) // b


def mlp_kernel(x_ref,
               w1_ref, b1_ref,
               w2_ref, b2_ref,
               w3_ref, b3_ref,
               w4_ref, b4_ref,
               o_ref):
    # bf16 operands into the MXU, f32 accumulation; bias-add / ReLU in f32.
    x = x_ref[...].astype(jnp.bfloat16)                      # cast in-kernel
    h = jnp.dot(x, w1_ref[...],
                preferred_element_type=jnp.float32) + b1_ref[...]
    h = jnp.maximum(h, 0.0)
    h = jnp.dot(h.astype(jnp.bfloat16), w2_ref[...],
                preferred_element_type=jnp.float32) + b2_ref[...]
    h = jnp.maximum(h, 0.0)
    h = jnp.dot(h.astype(jnp.bfloat16), w3_ref[...],
                preferred_element_type=jnp.float32) + b3_ref[...]
    h = jnp.maximum(h, 0.0)
    o_ref[...] = (jnp.dot(h.astype(jnp.bfloat16), w4_ref[...],
                          preferred_element_type=jnp.float32)
                  + b4_ref[...]).astype(o_ref.dtype)


@jax.jit
def mlp_forward(x, pp):
    """x: [B, N] float32 (raw, unpadded). pp: padded params (bf16 weights,
    f32 biases [1, out]). Returns [B, 2] float32."""
    B, N = x.shape
    out_w = pp["w4"].shape[1]

    # Batch tiling: few evenly sized steps; >=2 steps once B is big enough so
    # both v7x TensorCores get work via the "parallel" grid axis.
    num_steps = _cdiv(B, MAX_TILE_B)
    if B >= 2 * MIN_SPLIT_B:
        num_steps = max(num_steps, 2)
    num_steps = max(num_steps, 1)
    tile_b = _round_up(_cdiv(B, num_steps), SUBLANE)
    grid = _cdiv(B, tile_b)            # Pallas masks the partial last tile

    args = (x,
            pp["w1"], pp["b1"],
            pp["w2"], pp["b2"],
            pp["w3"], pp["b3"],
            pp["w4"], pp["b4"])

    x_spec = pl.BlockSpec((tile_b, N), lambda i: (i, 0))
    # Constant block index -> weights/biases resident, no re-DMA across grid.
    const_specs = [pl.BlockSpec(a.shape, lambda i: (0, 0)) for a in args[1:]]
    out_spec = pl.BlockSpec((tile_b, out_w), lambda i: (i, 0))

    # VMEM budget (counted once): double-buffered x/out tiles, resident
    # (conservatively double-buffered) bf16 weights + f32 biases, a handful of
    # f32 intermediates; generous slack; cap at 48 MiB (v7x headroom).
    h_max = max(pp[f"w{i}"].shape[1] for i in range(1, 5))
    w_bytes = 2 * sum(pp[f"w{i}"].size * 2 for i in range(1, 5))
    b_bytes = 2 * sum(pp[f"b{i}"].size * 4 for i in range(1, 5))
    io_bytes = 2 * tile_b * N * 4 + 2 * tile_b * out_w * 4
    scratch_bytes = 4 * tile_b * h_max * 4
    vmem_limit = min(2 * (w_bytes + b_bytes + io_bytes + scratch_bytes)
                     + (8 << 20), 48 << 20)

    out = pl.pallas_call(
        mlp_kernel,
        out_shape=jax.ShapeDtypeStruct((B, out_w), jnp.float32),
        grid=(grid,),
        in_specs=[x_spec] + const_specs,
        out_specs=out_spec,
        compiler_params=pltpu.CompilerParams(
            dimension_semantics=("parallel",),
            vmem_limit_bytes=int(vmem_limit)),
    )(*args)

    return out[:, :2]


def init_params(key, input_size):
    """PyTorch-style uniform(+/- 1/sqrt(fan_in)) init.

    Weights stored already transposed to [in, out]; biases as [out]."""
    n = input_size
    dims = [(n, n), (n, n // 2), (n // 2, n // 4), (n // 4, 2)]
    params = {}
    keys = jax.random.split(key, 2 * len(dims))
    for idx, (fan_in, fan_out) in enumerate(dims):
        bound = 1.0 / (float(fan_in) ** 0.5)
        w = jax.random.uniform(keys[2 * idx], (fan_in, fan_out),
                               minval=-bound, maxval=bound, dtype=jnp.float32)
        b = jax.random.uniform(keys[2 * idx + 1], (fan_out,),
                               minval=-bound, maxval=bound, dtype=jnp.float32)
        params[f"w{idx + 1}"] = w
        params[f"b{idx + 1}"] = b
    return params


def pad_params(params, input_size):
    """Pad params for the kernel.

    Layer 1 keeps its true contraction width N (matches the raw x block);
    hidden widths are padded to 128 lanes (lane-dense, VMEM-resident only);
    the final output is padded to OUT_W=8 lanes to keep the HBM writeback
    tiny.  Padding is exact: padded weight/bias lanes are zero and ReLU(0)=0.
    Weights -> bf16 [in_p, out_p]; biases -> f32 [1, out_p]."""
    n = input_size
    true_dims = [(n, n), (n, n // 2), (n // 2, n // 4), (n // 4, 2)]
    in_pads = [n,
               _round_up(n, LANE),
               _round_up(n // 2, LANE),
               _round_up(n // 4, LANE)]
    out_pads = [_round_up(n, LANE),
                _round_up(n // 2, LANE),
                _round_up(n // 4, LANE),
                _round_up(2, OUT_W)]
    padded = {}
    for idx in range(1, 5):
        w = params[f"w{idx}"]
        b = params[f"b{idx}"]
        fi, fo = true_dims[idx - 1]
        fi_p, fo_p = in_pads[idx - 1], out_pads[idx - 1]
        wp = jnp.zeros((fi_p, fo_p), jnp.float32).at[:fi, :fo].set(w)
        bp = jnp.zeros((1, fo_p), jnp.float32).at[0, :fo].set(b)
        padded[f"w{idx}"] = wp.astype(jnp.bfloat16)
        padded[f"b{idx}"] = bp
    return padded


def mlp_reference(x, pp):
    """Pure-JAX reference with the same padding / bf16 casts as the kernel."""
    xp = x.astype(jnp.bfloat16)
    h = jnp.maximum(jnp.dot(xp, pp["w1"],
                            preferred_element_type=jnp.float32) + pp["b1"], 0.0)
    h = jnp.maximum(jnp.dot(h.astype(jnp.bfloat16), pp["w2"],
                            preferred_element_type=jnp.float32) + pp["b2"], 0.0)
    h = jnp.maximum(jnp.dot(h.astype(jnp.bfloat16), pp["w3"],
                            preferred_element_type=jnp.float32) + pp["b3"], 0.0)
    out = jnp.dot(h.astype(jnp.bfloat16), pp["w4"],
                  preferred_element_type=jnp.float32) + pp["b4"]
    return out[:, :2]


if __name__ == "__main__":
    input_size = 32   # layers: 32 -> 32 -> 16 -> 8 -> 2
    batch = 8

    key = jax.random.PRNGKey(0)
    key_x, key_p = jax.random.split(key)
    x = jax.random.normal(key_x, (batch, input_size), dtype=jnp.float32)

    params = init_params(key_p, input_size)
    pp = pad_params(params, input_size)

    out = mlp_forward(x, pp)
    out = jax.block_until_ready(out)

    ref = mlp_reference(x, pp)
    assert out.shape == (batch, 2), out.shape
    assert jnp.allclose(out, ref, atol=2e-3, rtol=2e-3), "mismatch vs reference"

    print("KERNEL_OK")
</pallas_src>

<mosaic_0001>
module attributes {stable_mosaic.version = 11 : i64} {
  func.func @mlp_kernel(%arg0: i32, %arg1: memref<8x32xf32, #tpu.memory_space<vmem>>, %arg2: memref<32x128xbf16, #tpu.memory_space<vmem>>, %arg3: memref<1x128xf32, #tpu.memory_space<vmem>>, %arg4: memref<128x128xbf16, #tpu.memory_space<vmem>>, %arg5: memref<1x128xf32, #tpu.memory_space<vmem>>, %arg6: memref<128x128xbf16, #tpu.memory_space<vmem>>, %arg7: memref<1x128xf32, #tpu.memory_space<vmem>>, %arg8: memref<128x8xbf16, #tpu.memory_space<vmem>>, %arg9: memref<1x8xf32, #tpu.memory_space<vmem>>, %arg10: memref<8x8xf32, #tpu.memory_space<vmem>>) attributes {dimension_semantics = [#tpu.dimension_semantics<parallel>], iteration_bounds = array<i64: 1>, scalar_prefetch = 0 : i64, scratch_operands = 0 : i64, tpu.core_type = #tpu.core_type<tc>, window_params = [{transform_indices = @transform_0, window_bounds = array<i64: 8, 32>}, {pipeline_mode = #tpu.pipeline_mode<synchronous>, transform_indices = @transform_1, window_bounds = array<i64: 32, 128>}, {pipeline_mode = #tpu.pipeline_mode<synchronous>, transform_indices = @transform_2, window_bounds = array<i64: 1, 128>}, {pipeline_mode = #tpu.pipeline_mode<synchronous>, transform_indices = @transform_3, window_bounds = array<i64: 128, 128>}, {pipeline_mode = #tpu.pipeline_mode<synchronous>, transform_indices = @transform_4, window_bounds = array<i64: 1, 128>}, {pipeline_mode = #tpu.pipeline_mode<synchronous>, transform_indices = @transform_5, window_bounds = array<i64: 128, 128>}, {pipeline_mode = #tpu.pipeline_mode<synchronous>, transform_indices = @transform_6, window_bounds = array<i64: 1, 128>}, {pipeline_mode = #tpu.pipeline_mode<synchronous>, transform_indices = @transform_7, window_bounds = array<i64: 128, 8>}, {pipeline_mode = #tpu.pipeline_mode<synchronous>, transform_indices = @transform_8, window_bounds = array<i64: 1, 8>}, {transform_indices = @transform_9, window_bounds = array<i64: 8, 8>}]} {
    %c0 = arith.constant 0 : index
    %c0_0 = arith.constant 0 : index
    %0 = vector.load %arg1[%c0, %c0_0] : memref<8x32xf32, #tpu.memory_space<vmem>>, vector<8x32xf32>
    %1 = arith.truncf %0 : vector<8x32xf32> to vector<8x32xbf16>
    %c0_1 = arith.constant 0 : index
    %c0_2 = arith.constant 0 : index
    %2 = vector.load %arg2[%c0_1, %c0_2] : memref<32x128xbf16, #tpu.memory_space<vmem>>, vector<32x128xbf16>
    %cst = arith.constant dense<0.000000e+00> : vector<8x128xf32>
    %3 = tpu.matmul %1, %2, %cst {dimension_numbers = #tpu.dot_dimension_numbers<[1], [0], [0], [1], [0, 0, 1, 1], [], []>} : vector<8x32xbf16>, vector<32x128xbf16>, vector<8x128xf32> -> vector<8x128xf32>
    %c0_3 = arith.constant 0 : index
    %c0_4 = arith.constant 0 : index
    %4 = vector.load %arg3[%c0_3, %c0_4] : memref<1x128xf32, #tpu.memory_space<vmem>>, vector<1x128xf32>
    %5 = vector.broadcast %4 : vector<1x128xf32> to vector<8x128xf32>
    %6 = arith.addf %3, %5 : vector<8x128xf32>
    %cst_5 = arith.constant 0.000000e+00 : f32
    %7 = vector.broadcast %cst_5 : f32 to vector<8x128xf32>
    %8 = arith.maximumf %6, %7 : vector<8x128xf32>
    %9 = arith.truncf %8 : vector<8x128xf32> to vector<8x128xbf16>
    %c0_6 = arith.constant 0 : index
    %c0_7 = arith.constant 0 : index
    %10 = vector.load %arg4[%c0_6, %c0_7] : memref<128x128xbf16, #tpu.memory_space<vmem>>, vector<128x128xbf16>
    %cst_8 = arith.constant dense<0.000000e+00> : vector<8x128xf32>
    %11 = tpu.matmul %9, %10, %cst_8 {dimension_numbers = #tpu.dot_dimension_numbers<[1], [0], [0], [1], [0, 0, 1, 1], [], []>} : vector<8x128xbf16>, vector<128x128xbf16>, vector<8x128xf32> -> vector<8x128xf32>
    %c0_9 = arith.constant 0 : index
    %c0_10 = arith.constant 0 : index
    %12 = vector.load %arg5[%c0_9, %c0_10] : memref<1x128xf32, #tpu.memory_space<vmem>>, vector<1x128xf32>
    %13 = vector.broadcast %12 : vector<1x128xf32> to vector<8x128xf32>
    %14 = arith.addf %11, %13 : vector<8x128xf32>
    %cst_11 = arith.constant 0.000000e+00 : f32
    %15 = vector.broadcast %cst_11 : f32 to vector<8x128xf32>
    %16 = arith.maximumf %14, %15 : vector<8x128xf32>
    %17 = arith.truncf %16 : vector<8x128xf32> to vector<8x128xbf16>
    %c0_12 = arith.constant 0 : index
    %c0_13 = arith.constant 0 : index
    %18 = vector.load %arg6[%c0_12, %c0_13] : memref<128x128xbf16, #tpu.memory_space<vmem>>, vector<128x128xbf16>
    %cst_14 = arith.constant dense<0.000000e+00> : vector<8x128xf32>
    %19 = tpu.matmul %17, %18, %cst_14 {dimension_numbers = #tpu.dot_dimension_numbers<[1], [0], [0], [1], [0, 0, 1, 1], [], []>} : vector<8x128xbf16>, vector<128x128xbf16>, vector<8x128xf32> -> vector<8x128xf32>
    %c0_15 = arith.constant 0 : index
    %c0_16 = arith.constant 0 : index
    %20 = vector.load %arg7[%c0_15, %c0_16] : memref<1x128xf32, #tpu.memory_space<vmem>>, vector<1x128xf32>
    %21 = vector.broadcast %20 : vector<1x128xf32> to vector<8x128xf32>
    %22 = arith.addf %19, %21 : vector<8x128xf32>
    %cst_17 = arith.constant 0.000000e+00 : f32
    %23 = vector.broadcast %cst_17 : f32 to vector<8x128xf32>
    %24 = arith.maximumf %22, %23 : vector<8x128xf32>
    %25 = arith.truncf %24 : vector<8x128xf32> to vector<8x128xbf16>
    %c0_18 = arith.constant 0 : index
    %c0_19 = arith.constant 0 : index
    %26 = vector.load %arg8[%c0_18, %c0_19] : memref<128x8xbf16, #tpu.memory_space<vmem>>, vector<128x8xbf16>
    %cst_20 = arith.constant dense<0.000000e+00> : vector<8x8xf32>
    %27 = tpu.matmul %25, %26, %cst_20 {dimension_numbers = #tpu.dot_dimension_numbers<[1], [0], [0], [1], [0, 0, 1, 1], [], []>} : vector<8x128xbf16>, vector<128x8xbf16>, vector<8x8xf32> -> vector<8x8xf32>
    %c0_21 = arith.constant 0 : index
    %c0_22 = arith.constant 0 : index
    %28 = vector.load %arg9[%c0_21, %c0_22] : memref<1x8xf32, #tpu.memory_space<vmem>>, vector<1x8xf32>
    %29 = vector.broadcast %28 : vector<1x8xf32> to vector<8x8xf32>
    %30 = arith.addf %27, %29 : vector<8x8xf32>
    %c0_23 = arith.constant 0 : index
    %c0_24 = arith.constant 0 : index
    %31 = vector.load %arg10[%c0_23, %c0_24] : memref<8x8xf32, #tpu.memory_space<vmem>>, vector<8x8xf32>
    tpu.vector_store %arg10[%c0_23, %c0_24], %30 {strides = array<i32>} : memref<8x8xf32, #tpu.memory_space<vmem>>, vector<8x8xf32>,
    return
  }
  func.func @transform_0(%arg0: i32) -> (i32, i32) {
    %c0_i32 = arith.constant 0 : i32
    %c0_i32_0 = arith.constant 0 : i32
    return %arg0, %c0_i32 : i32, i32
  }
  func.func @transform_1(%arg0: i32) -> (i32, i32) {
    %c0_i32 = arith.constant 0 : i32
    %c0_i32_0 = arith.constant 0 : i32
    %c0_i32_1 = arith.constant 0 : i32
    return %c0_i32, %c0_i32_0 : i32, i32
  }
  func.func @transform_2(%arg0: i32) -> (i32, i32) {
    %c0_i32 = arith.constant 0 : i32
    %c0_i32_0 = arith.constant 0 : i32
    %c0_i32_1 = arith.constant 0 : i32
    return %c0_i32, %c0_i32_0 : i32, i32
  }
  func.func @transform_3(%arg0: i32) -> (i32, i32) {
    %c0_i32 = arith.constant 0 : i32
    %c0_i32_0 = arith.constant 0 : i32
    %c0_i32_1 = arith.constant 0 : i32
    return %c0_i32, %c0_i32_0 : i32, i32
  }
  func.func @transform_4(%arg0: i32) -> (i32, i32) {
    %c0_i32 = arith.constant 0 : i32
    %c0_i32_0 = arith.constant 0 : i32
    %c0_i32_1 = arith.constant 0 : i32
    return %c0_i32, %c0_i32_0 : i32, i32
  }
  func.func @transform_5(%arg0: i32) -> (i32, i32) {
    %c0_i32 = arith.constant 0 : i32
    %c0_i32_0 = arith.constant 0 : i32
    %c0_i32_1 = arith.constant 0 : i32
    return %c0_i32, %c0_i32_0 : i32, i32
  }
  func.func @transform_6(%arg0: i32) -> (i32, i32) {
    %c0_i32 = arith.constant 0 : i32
    %c0_i32_0 = arith.constant 0 : i32
    %c0_i32_1 = arith.constant 0 : i32
    return %c0_i32, %c0_i32_0 : i32, i32
  }
  func.func @transform_7(%arg0: i32) -> (i32, i32) {
    %c0_i32 = arith.constant 0 : i32
    %c0_i32_0 = arith.constant 0 : i32
    %c0_i32_1 = arith.constant 0 : i32
    return %c0_i32, %c0_i32_0 : i32, i32
  }
  func.func @transform_8(%arg0: i32) -> (i32, i32) {
    %c0_i32 = arith.constant 0 : i32
    %c0_i32_0 = arith.constant 0 : i32
    %c0_i32_1 = arith.constant 0 : i32
    return %c0_i32, %c0_i32_0 : i32, i32
  }
  func.func @transform_9(%arg0: i32) -> (i32, i32) {
    %c0_i32 = arith.constant 0 : i32
    %c0_i32_0 = arith.constant 0 : i32
    return %arg0, %c0_i32 : i32, i32
  }
}

</mosaic_0001>

<bundles_post_ra>
// kernel: mlp_forward.1
= control target key start
LH: loop header
LB: loop body
LE: loop exit
PB: predicated region body
PF: predicated region fallthrough
CT: control target
= control target key end

     0   :  { %14 = vsyncpa [#allocation3], 0  ;;  %s844_s0 = inlined_call_operand.vmem [shape: f32[8,32], index: 0, kind: input, shape index: {}]   ;;  %s845_s1 = inlined_call_operand.hbm [shape: bf16[32,128], index: 1, kind: input, shape index: {}]   ;;  %s846_s2 = inlined_call_operand.vmem [shape: f32[1,128], index: 2, kind: input, shape index: {}]   ;;  %s847_s3 = inlined_call_operand.vmem [shape: bf16[128,128], index: 3, kind: input, shape index: {}]   ;;  %s848_s4 = inlined_call_operand.vmem [shape: f32[1,128], index: 4, kind: input, shape index: {}]   ;;  %s849_s5 = inlined_call_operand.hbm [shape: bf16[128,128], index: 5, kind: input, shape index: {}]   ;;  %s850_s6 = inlined_call_operand.vmem [shape: f32[1,128], index: 6, kind: input, shape index: {}]   ;;  %s851_s7 = inlined_call_operand.vmem [shape: bf16[128,8], index: 7, kind: input, shape index: {}]   ;;  %s852_s8 = inlined_call_operand.vmem [shape: f32[1,8], index: 8, kind: input, shape index: {}]   ;;  %s853_s9 = inlined_call_operand.vmem [shape: f32[8,8], index: 9, kind: output, shape index: {}]  }
   0x1   :  { %15 = vsyncpa [#allocation5], 0  ;;  %s682_s30 = smov [#allocation2]  }
   0x2   :  { %s23_s10 = sshll.u32 %s682_s30, 4  ;;  %s24_s10 = int_to_ptr.vmem [resolvable:$true] %s23_s10 }
   0x3   :  { %s646_s11 = scalar_lea.vmem %s24_s10, 256  ;;  %p651_p1 = scmp.lt.s32.totalorder %s24_s10, %s24_s10 }
   0x4   :  { %p647_p0 = scmp.ne.s32.totalorder %s24_s10, %s646_s11  ;;  %p652_p2 = scmp.lt.s32.totalorder %s646_s11, %s646_s11 }
   0x6   :  { %p653_p3 = por %p652_p2, %p651_p1 }
   0x8   :  { %p654_p4 = pnand %p653_p3, %p647_p0 }
   0xa   :  { %657 = shalt.err (!%p654_p4)
}
   0xb   :  { %s683_s12 = smov 64   ;;  %s684_s13 = smov 4  }
   0xc   :  { %29 = dma.hbm_to_vmem [thread:$0]  %s845_s1, 256, %s24_s10, [#allocation3], %s683_s12, %s683_s12, %s684_s13  }
   0xd   :  { %s685_s16 = smov [#allocation4]  }
   0xe   :  { %s41_s17 = sshll.u32 %s685_s16, 4  ;;  %s42_s17 = int_to_ptr.vmem [resolvable:$true] %s41_s17 }
   0xf   :  { %s666_s18 = scalar_lea.vmem %s42_s17, 1024  ;;  %p671_p6 = scmp.lt.s32.totalorder %s42_s17, %s42_s17 }
  0x10   :  { %p667_p5 = scmp.ne.s32.totalorder %s42_s17, %s666_s18  ;;  %p672_p7 = scmp.lt.s32.totalorder %s666_s18, %s666_s18 }
  0x12   :  { %p673_p8 = por %p672_p7, %p671_p6 }
  0x14   :  { %p674_p9 = pnand %p673_p8, %p667_p5 }
  0x16   :  { %677 = shalt.err (!%p674_p9)
}
  0x17   :  { %47 = dma.hbm_to_vmem [thread:$0]  %s849_s5, 1024, %s42_s17, [#allocation5], %s683_s12, %s683_s12, %s684_s13  }
  0x18   :  { %678 = dma.done.wait [#allocation3], 256  }
  0x19   :  { %679 = vsyncadd [#allocation3], 4294967040 }
  0x1a   :  { %680 = dma.done.wait [#allocation5], 1024  }
  0x1b   :  { %681 = vsyncadd [#allocation5], 4294966272  ;;  %v686_v0 = vmov 0.0   ;;  %vm687_vm0 = vmmov 0   ;;  %v612_v1 = vld [vmem:[#allocation2 + $0x8] sm:$0xff]   ;;  %v613_v2 = vld [vmem:[#allocation2] sm:$0xff]  }
  0x1c   :  { %538 = vmatprep.subr.bf16.mxu0 %v686_v0  ;;  %542 = vmatprep.mubr.msk.bf16.mxu0 %vm687_vm0, %v686_v0  ;;  %v61_v3 = vld [vmem:[%s844_s0] sm:$0xff]  ;;  %v614_v4 = vld [vmem:[%s847_s3 + $0x38] sm:$0xff]   ;;  %v615_v6 = vld [vmem:[%s847_s3 + $0x30] sm:$0xff]   ;;  %vm86_vm1 = vcmask 261120   ;;  %vm469_vm2 = vcmask 64512  }
  0x1d   :  { %546 = vmatprep.subr.bf16.mxu1 %v686_v0  ;;  %562 = vmatprep.mubr.msk.bf16.mxu1 %vm687_vm0, %v686_v0  ;;  %v62_v5 = vpack.c.bf16 %v61_v3, %v61_v3  ;;  %v616_v7 = vld [vmem:[%s847_s3 + $0x28] sm:$0xff]   ;;  %v617_v8 = vld [vmem:[%s847_s3 + $0x20] sm:$0xff]   ;;  %v618_v9 = vld [vmem:[%s847_s3 + $0x18] sm:$0xff]  }
  0x1e   :  { %539 = vmatpush3.bf16.msra.mxu0 %v612_v1  ;;  %547 = vmatpush3.bf16.msra.mxu1 %v614_v4  ;;  %v619_v10 = vld [vmem:[%s847_s3 + $0x10] sm:$0xff]   ;;  %v620_v11 = vld [vmem:[%s847_s3 + $0x8] sm:$0xff]   ;;  %v621_v12 = vld [vmem:[%s847_s3] sm:$0xff]  }
  0x1f   :  { %540 = vmatprep.subr.bf16.mxu0 %v686_v0  ;;  %548 = vmatprep.subr.bf16.mxu1 %v686_v0  ;;  %v622_v13 = vld [vmem:[#allocation4 + $0x38] sm:$0xff]   ;;  %v623_v14 = vld [vmem:[#allocation4 + $0x30] sm:$0xff]   ;;  %v624_v15 = vld [vmem:[#allocation4 + $0x28] sm:$0xff]  }
  0x20   :  { %v625_v16 = vld [vmem:[#allocation4 + $0x20] sm:$0xff]   ;;  %v626_v17 = vld [vmem:[#allocation4 + $0x18] sm:$0xff]   ;;  %v627_v18 = vld [vmem:[#allocation4 + $0x10] sm:$0xff]  }
  0x21   :  { %v477_v19 = vld [vmem:[%s846_s2] ss:$0 sm:$0xff]  ;;  %v628_v27 = vld [vmem:[#allocation4 + $0x8] sm:$0xff]   ;;  %v629_v28 = vld [vmem:[#allocation4] sm:$0xff]  }
  0x22   :  { %541 = vmatpush3.bf16.msra.mxu0 %v613_v2  ;;  %549 = vmatpush3.bf16.msra.mxu1 %v615_v6  ;;  %v630_v29 = vld [vmem:[%s851_s7 + $0x38] sm:$0xff]   ;;  %v631_v30 = vld [vmem:[%s851_s7 + $0x30] sm:$0xff]   ;;  %v632_v31 = vld [vmem:[%s851_s7 + $0x28] sm:$0xff]  }
  0x23   :  { %566 = vmatprep.subr.bf16.mxu0 %v686_v0  ;;  %550 = vmatprep.subr.bf16.mxu1 %v686_v0  ;;  %v633_v32 = vld [vmem:[%s851_s7 + $0x20] sm:$0xff]   ;;  %v634_v33 = vld [vmem:[%s851_s7 + $0x18] sm:$0xff]   ;;  %v635_v34 = vld [vmem:[%s851_s7 + $0x10] sm:$0xff]  }
  0x24   :  { %v481_v35 = vld [vmem:[%s848_s4] ss:$0 sm:$0xff]  ;;  %v636_v43 = vld [vmem:[%s851_s7 + $0x8] sm:$0xff]  }
  0x25   :  { %543 = vmatmul.mubr.msk.bf16.vlgmr.msra.gmra.mxu0 %vm86_vm1, %v62_v5  ;;  %v637_v44 = vld [vmem:[%s851_s7] sm:$0xff]  }
  0x26   :  { %582 = vmatprep.mubr.msk.bf16.mxu0 %vm687_vm0, %v686_v0  ;;  %551 = vmatpush3.bf16.msra.mxu1 %v616_v7  ;;  %v490_v45 = vld [vmem:[%s850_s6] ss:$0 sm:$0xff] }
  0x27   :  { %552 = vmatprep.subr.bf16.mxu1 %v686_v0  ;;  %567 = vmatpush3.bf16.msra.mxu0 %v622_v13  ;;  %v499_v53 = vld [vmem:[%s852_s8] ss:$0 sm:$0xff] }
  0x28   :  { %568 = vmatprep.subr.bf16.mxu0 %v686_v0 }
  0x2a   :  { %553 = vmatpush3.bf16.msra.mxu1 %v617_v8 }
  0x2b   :  { %554 = vmatprep.subr.bf16.mxu1 %v686_v0  ;;  %569 = vmatpush3.bf16.msra.mxu0 %v623_v14 }
  0x2c   :  { %570 = vmatprep.subr.bf16.mxu0 %v686_v0 }
  0x2e   :  { %555 = vmatpush3.bf16.msra.mxu1 %v618_v9 }
  0x2f   :  { %556 = vmatprep.subr.bf16.mxu1 %v686_v0  ;;  %571 = vmatpush3.bf16.msra.mxu0 %v624_v15 }
  0x30   :  { %572 = vmatprep.subr.bf16.mxu0 %v686_v0 }
  0x32   :  { %557 = vmatpush3.bf16.msra.mxu1 %v619_v10 }
  0x33   :  { %558 = vmatprep.subr.bf16.mxu1 %v686_v0  ;;  %573 = vmatpush3.bf16.msra.mxu0 %v625_v16 }
  0x34   :  { %574 = vmatprep.subr.bf16.mxu0 %v686_v0 }
  0x36   :  { %559 = vmatpush3.bf16.msra.mxu1 %v620_v11 }
  0x37   :  { %560 = vmatprep.subr.bf16.mxu1 %v686_v0  ;;  %575 = vmatpush3.bf16.msra.mxu0 %v626_v17 }
  0x38   :  { %576 = vmatprep.subr.bf16.mxu0 %v686_v0 }
  0x3a   :  { %561 = vmatpush3.bf16.msra.mxu1 %v621_v12 }
  0x3b   :  { %586 = vmatprep.subr.bf16.mxu1 %v686_v0  ;;  %577 = vmatpush3.bf16.msra.mxu0 %v627_v18 }
  0x3c   :  { %578 = vmatprep.subr.bf16.mxu0 %v686_v0 }
  0x3f   :  { %579 = vmatpush3.bf16.msra.mxu0 %v628_v27 }
  0x40   :  { %580 = vmatprep.subr.bf16.mxu0 %v686_v0 }
  0x43   :  { %581 = vmatpush3.bf16.msra.mxu0 %v629_v28 }
  0xe5   :  { %v124_v20 = vpop.f32.mrf.mxu0 }
  0xe6   :  { %v125_v21 = vadd.f32 %v477_v19, %v124_v20 }
  0xe7   :  { %v544_v22 = vpop.f32.mrf.mxu0 }
  0xe8   :  { %v130_v23 = vmax.f32 %v125_v21, 0.0 }
  0xe9   :  { %v127_v24 = vpop.f32.mrf.mxu0 }
  0xea   :  { %v131_v25 = vpack.c.bf16 %v130_v23, %v130_v23 }
  0xeb   :  { %v545_v26 = vpop.f32.mrf.mxu0 }
  0xec   :  { %563 = vmatmul.mubr.bf16.vlgmr.msra.gmra.mxu1 %v131_v25 }
  0xed   :  { %602 = vmatprep.mubr.msk.bf16.mxu1 %vm687_vm0, %v686_v0  ;;  %587 = vmatpush3.bf16.msra.mxu1 %v630_v29 }
  0xee   :  { %588 = vmatprep.subr.bf16.mxu1 %v686_v0 }
  0xf1   :  { %589 = vmatpush3.bf16.msra.mxu1 %v631_v30 }
  0xf2   :  { %590 = vmatprep.subr.bf16.mxu1 %v686_v0 }
  0xf5   :  { %591 = vmatpush3.bf16.msra.mxu1 %v632_v31 }
  0xf6   :  { %592 = vmatprep.subr.bf16.mxu1 %v686_v0 }
  0xf9   :  { %593 = vmatpush3.bf16.msra.mxu1 %v633_v32 }
  0xfa   :  { %594 = vmatprep.subr.bf16.mxu1 %v686_v0 }
  0xfd   :  { %595 = vmatpush3.bf16.msra.mxu1 %v634_v33 }
  0xfe   :  { %596 = vmatprep.subr.bf16.mxu1 %v686_v0 }
 0x101   :  { %597 = vmatpush3.bf16.msra.mxu1 %v635_v34 }
 0x102   :  { %598 = vmatprep.subr.bf16.mxu1 %v686_v0 }
 0x105   :  { %599 = vmatpush3.bf16.msra.mxu1 %v636_v43 }
 0x106   :  { %600 = vmatprep.subr.bf16.mxu1 %v686_v0 }
 0x109   :  { %601 = vmatpush3.bf16.msra.mxu1 %v637_v44 }
 0x1ac   :  { %v237_v36 = vpop.f32.mrf.mxu1 }
 0x1ad   :  { %v238_v37 = vadd.f32 %v481_v35, %v237_v36 }
 0x1ae   :  { %v564_v38 = vpop.f32.mrf.mxu1 }
 0x1af   :  { %v243_v39 = vmax.f32 %v238_v37, 0.0 }
 0x1b0   :  { %v240_v40 = vpop.f32.mrf.mxu1 }
 0x1b1   :  { %v244_v41 = vpack.c.bf16 %v243_v39, %v243_v39 }
 0x1b2   :  { %v565_v42 = vpop.f32.mrf.mxu1 }
 0x1b3   :  { %583 = vmatmul.mubr.bf16.vlgmr.msra.gmra.mxu0 %v244_v41 }
 0x273   :  { %v350_v46 = vpop.f32.mrf.mxu0 }
 0x274   :  { %v351_v47 = vadd.f32 %v490_v45, %v350_v46 }
 0x275   :  { %v584_v48 = vpop.f32.mrf.mxu0 }
 0x276   :  { %v356_v49 = vmax.f32 %v351_v47, 0.0 }
 0x277   :  { %v353_v50 = vpop.f32.mrf.mxu0 }
 0x278   :  { %v357_v51 = vpack.c.bf16 %v356_v49, %v356_v49 }
 0x279   :  { %v585_v52 = vpop.f32.mrf.mxu0 }
 0x27a   :  { %603 = vmatmul.mubr.bf16.vlgmr.msra.gmra.mxu1 %v357_v51 }
 0x33a   :  { %v463_v54 = vpop.f32.mrf.mxu1 }
 0x33b   :  { %v464_v55 = vadd.f32 %v499_v53, %v463_v54 }
 0x33c   :  { %v604_v56 = vpop.f32.mrf.mxu1 }
 0x33d   :  { %470 = vst.msk [vmem:[%s853_s9] sm:$0xff] %vm469_vm2, %v464_v55 }
 0x33e   :  { %v466_v57 = vpop.f32.mrf.mxu1 }
 0x340   :  { %v605_v58 = vpop.f32.mrf.mxu1 }
 0x341   :  { %475 = vsyncpa [#allocation3], 1 }
 0x342   :  { %476 = vsyncpa [#allocation5], 1 }

</bundles_post_ra>
